<compile_context>
chip_gen: v7x
topology: tpu7x:2x2x1
jax: 0.10.0
libtpu: 0.0.40
codegen_flags: <defaults>
</compile_context>

<pallas_src>
import jax
import jax.numpy as jnp
from jax.experimental import pallas as pl
from jax.experimental.pallas import tpu as pltpu

EPS = 1e-5  # nn.BatchNorm2d default eps
VMEM_LIMIT = 32 * 1024 * 1024  # conservative for v7x's 64 MiB physical VMEM


def _round_up(a, b):
    return (a + b - 1) // b * b


# ---------------------------------------------------------------------------
# Pass 1: PartialConv (masked conv / mask_sum, hole zeroing) + per-channel
#         sum / sum-of-squares accumulation for BatchNorm statistics.
# Layout: patches [CKK, tileR], weight [O, CKK], conv out [O, tileR] (R on
# lanes, channels on sublanes -> lane-dense stores).
# ---------------------------------------------------------------------------
def pconv_stats_kernel(patch_ref, w_ref, msum_ref, conv_ref, sum_ref, ssq_ref):
    # [O, CKK] @ [CKK, tileR] -> [O, tileR] on the MXU, f32 accumulate.
    out = jnp.dot(w_ref[...], patch_ref[...],
                  preferred_element_type=jnp.float32)

    msum = msum_ref[...]                       # [1, tileR]
    holes = msum == 0.0                        # mask entries are exactly 0/1
    out = jnp.where(holes, 0.0, out / jnp.where(holes, 1.0, msum))

    conv_ref[...] = out

    tsum = jnp.sum(out, axis=1, keepdims=True)          # [O, 1]  (XLU reduce)
    tssq = jnp.sum(out * out, axis=1, keepdims=True)    # [O, 1]

    @pl.when(pl.program_id(0) == 0)
    def _():
        sum_ref[...] = jnp.zeros_like(sum_ref)
        ssq_ref[...] = jnp.zeros_like(ssq_ref)

    sum_ref[...] += tsum
    ssq_ref[...] += tssq


# ---------------------------------------------------------------------------
# Pass 2: BatchNorm (precomputed per-channel scale/shift) + ReLU, fused.
# ---------------------------------------------------------------------------
def bn_relu_kernel(conv_ref, scale_ref, shift_ref, out_ref):
    out_ref[...] = jnp.maximum(
        conv_ref[...] * scale_ref[...] + shift_ref[...], 0.0)


# ---------------------------------------------------------------------------
# Wrapper glue: NCHW <-> transposed im2col, mask_sum, pallas_call plumbing.
# ---------------------------------------------------------------------------
def _im2col_T(x):
    """x: [N, C, H, W] -> [C*9, N*H*W]  (C-major, (ky,kx)-minor rows; columns
    ordered as (n, h, w)), matching weight.reshape(O, C*9)."""
    N, C, H, W = x.shape
    xp = jnp.pad(x, ((0, 0), (0, 0), (1, 1), (1, 1)))
    cols = [xp[:, :, dy:dy + H, dx:dx + W] for dy in range(3) for dx in range(3)]
    p = jnp.stack(cols, axis=0)                 # [9, N, C, H, W]
    p = jnp.transpose(p, (2, 0, 1, 3, 4))       # [C, 9, N, H, W]
    return p.reshape(C * 9, N * H * W)


def pcbactiv_forward(x, mask, weight, gamma, beta, *, tile_r=512):
    """x, mask: NCHW float. weight: [O, C, 3, 3]. Returns (h, new_mask) NCHW."""
    N, C, H, W = x.shape
    O = weight.shape[0]
    CKK = C * 9
    R = N * H * W

    tile_r = min(tile_r, _round_up(R, 128))
    R_pad = _round_up(R, tile_r)
    n_tiles = R_pad // tile_r

    # PartialConv operand: conv(x * mask). Pre-multiply before im2col so the
    # kernel sees a single input stream instead of patches + mask-patches.
    masked = (x * mask).astype(jnp.float32)
    patches_t = _im2col_T(masked)                              # [CKK, R]

    # mask_conv has all-ones weights & no bias -> every output channel equals
    # the 3x3 box-sum of the channel-summed mask. One number per pixel.
    mc = jnp.sum(mask.astype(jnp.float32), axis=1)             # [N, H, W]
    mcp = jnp.pad(mc, ((0, 0), (1, 1), (1, 1)))
    msum = sum(mcp[:, dy:dy + H, dx:dx + W]
               for dy in range(3) for dx in range(3))          # [N, H, W]
    msum_flat = msum.reshape(1, R)

    if R_pad != R:  # zero-padded rows are holes -> conv out 0, stats unchanged
        patches_t = jnp.pad(patches_t, ((0, 0), (0, R_pad - R)))
        msum_flat = jnp.pad(msum_flat, ((0, 0), (0, R_pad - R)))

    wk = weight.reshape(O, CKK).astype(jnp.float32)            # [O, CKK]

    conv_t, csum, cssq = pl.pallas_call(
        pconv_stats_kernel,
        out_shape=(jax.ShapeDtypeStruct((O, R_pad), jnp.float32),
                   jax.ShapeDtypeStruct((O, 1), jnp.float32),
                   jax.ShapeDtypeStruct((O, 1), jnp.float32)),
        grid=(n_tiles,),
        in_specs=[
            pl.BlockSpec((CKK, tile_r), lambda i: (0, i)),
            pl.BlockSpec((O, CKK), lambda i: (0, 0)),
            pl.BlockSpec((1, tile_r), lambda i: (0, i)),
        ],
        out_specs=(pl.BlockSpec((O, tile_r), lambda i: (0, i)),
                   pl.BlockSpec((O, 1), lambda i: (0, 0)),
                   pl.BlockSpec((O, 1), lambda i: (0, 0))),
        compiler_params=pltpu.CompilerParams(
            dimension_semantics=("arbitrary",),   # resident stat accumulators
            vmem_limit_bytes=VMEM_LIMIT),
    )(patches_t, wk, msum_flat)

    # BatchNorm2d training-mode batch stats (biased variance over N*H*W per
    # channel). Only 2*O scalars: fold into per-channel scale/shift here.
    mean = csum / R                                           # [O, 1]
    var = jnp.maximum(cssq / R - mean * mean, 0.0)            # [O, 1]
    scale = gamma.reshape(O, 1).astype(jnp.float32) * jax.lax.rsqrt(var + EPS)
    shift = beta.reshape(O, 1).astype(jnp.float32) - mean * scale

    h_t = pl.pallas_call(
        bn_relu_kernel,
        out_shape=jax.ShapeDtypeStruct((O, R_pad), jnp.float32),
        grid=(n_tiles,),
        in_specs=[
            pl.BlockSpec((O, tile_r), lambda i: (0, i)),
            pl.BlockSpec((O, 1), lambda i: (0, 0)),
            pl.BlockSpec((O, 1), lambda i: (0, 0)),
        ],
        out_specs=pl.BlockSpec((O, tile_r), lambda i: (0, i)),
        compiler_params=pltpu.CompilerParams(
            dimension_semantics=("parallel",),    # megacore-shardable on v7x
            vmem_limit_bytes=VMEM_LIMIT),
    )(conv_t, scale, shift)

    # Back to PyTorch NCHW.
    h = h_t[:, :R].reshape(O, N, H, W).transpose(1, 0, 2, 3)

    # new_mask is identical across output channels: 1 where the receptive
    # field saw any valid pixel, else 0. Derived from msum, broadcast outside.
    new_mask = jnp.broadcast_to(
        (msum > 0.0).astype(jnp.float32)[:, None, :, :], (N, O, H, W))
    return h, new_mask


# ---------------------------------------------------------------------------
# Pure-JAX reference (for a sanity check).
# ---------------------------------------------------------------------------
def _reference(x, mask, weight, gamma, beta):
    dn = ("NCHW", "OIHW", "NCHW")
    out = jax.lax.conv_general_dilated(
        x * mask, weight, (1, 1), ((1, 1), (1, 1)), dimension_numbers=dn,
        precision=jax.lax.Precision.HIGHEST)
    msk = jax.lax.conv_general_dilated(
        mask, jnp.ones_like(weight), (1, 1), ((1, 1), (1, 1)),
        dimension_numbers=dn, precision=jax.lax.Precision.HIGHEST)
    holes = msk == 0.0
    out = jnp.where(holes, 0.0, out / jnp.where(holes, 1.0, msk))
    new_mask = jnp.where(holes, 0.0, 1.0)
    mean = out.mean(axis=(0, 2, 3), keepdims=True)
    var = ((out - mean) ** 2).mean(axis=(0, 2, 3), keepdims=True)
    h = (out - mean) * jax.lax.rsqrt(var + EPS)
    h = h * gamma.reshape(1, -1, 1, 1) + beta.reshape(1, -1, 1, 1)
    return jnp.maximum(h, 0.0), new_mask


if __name__ == "__main__":
    # Small shapes consistent with PCBActiv(in_ch=4, out_ch=8, sample='none-3',
    # bn=True, activ='relu', conv_bias=False): 3x3 conv, stride 1, pad 1.
    N, C, O, H, W = 2, 4, 8, 16, 16

    key = jax.random.PRNGKey(0)
    kx, km, kw = jax.random.split(key, 3)

    x = jax.random.normal(kx, (N, C, H, W), dtype=jnp.float32)
    mask = (jax.random.uniform(km, (N, C, H, W)) > 0.3).astype(jnp.float32)

    # Deterministic "kaiming_normal_(a=0, mode='fan_in')"-style init:
    # std = sqrt(2 / fan_in), fan_in = C*3*3.
    fan_in = C * 3 * 3
    std = (2.0 / fan_in) ** 0.5
    weight = std * jax.random.normal(kw, (O, C, 3, 3), dtype=jnp.float32)

    # BatchNorm2d affine params at their PyTorch init values.
    gamma = jnp.ones((O,), dtype=jnp.float32)
    beta = jnp.zeros((O,), dtype=jnp.float32)

    # tile_r=128 -> 4 row tiles at this small shape (exercises the pipelined,
    # multi-tile stat-accumulation path). Default of 512 is used for real sizes.
    h, h_mask = pcbactiv_forward(x, mask, weight, gamma, beta, tile_r=128)
    jax.block_until_ready((h, h_mask))

    assert h.shape == (N, O, H, W) and h_mask.shape == (N, O, H, W)

    # Sanity check vs pure-JAX reference (loose tol for MXU f32 rounding).
    h_ref, m_ref = _reference(x, mask, weight, gamma, beta)
    assert jnp.allclose(h_mask, m_ref)
    assert jnp.allclose(h, h_ref, atol=2e-2, rtol=2e-2)

    print("KERNEL_OK")
</pallas_src>

<mosaic_0001>
module attributes {stable_mosaic.version = 11 : i64} {
  func.func @pconv_stats_kernel(%arg0: i32, %arg1: memref<36x128xf32, #tpu.memory_space<vmem>>, %arg2: memref<8x36xf32, #tpu.memory_space<vmem>>, %arg3: memref<1x128xf32, #tpu.memory_space<vmem>>, %arg4: memref<8x128xf32, #tpu.memory_space<vmem>>, %arg5: memref<8x1xf32, #tpu.memory_space<vmem>>, %arg6: memref<8x1xf32, #tpu.memory_space<vmem>>) attributes {dimension_semantics = [#tpu.dimension_semantics<arbitrary>], iteration_bounds = array<i64: 4>, scalar_prefetch = 0 : i64, scratch_operands = 0 : i64, tpu.core_type = #tpu.core_type<tc>, window_params = [{transform_indices = @transform_0, window_bounds = array<i64: 36, 128>}, {pipeline_mode = #tpu.pipeline_mode<synchronous>, transform_indices = @transform_1, window_bounds = array<i64: 8, 36>}, {transform_indices = @transform_2, window_bounds = array<i64: 1, 128>}, {transform_indices = @transform_3, window_bounds = array<i64: 8, 128>}, {pipeline_mode = #tpu.pipeline_mode<synchronous>, transform_indices = @transform_4, window_bounds = array<i64: 8, 1>}, {pipeline_mode = #tpu.pipeline_mode<synchronous>, transform_indices = @transform_5, window_bounds = array<i64: 8, 1>}]} {
    %c0 = arith.constant 0 : index
    %c0_0 = arith.constant 0 : index
    %0 = vector.load %arg2[%c0, %c0_0] : memref<8x36xf32, #tpu.memory_space<vmem>>, vector<8x36xf32>
    %c0_1 = arith.constant 0 : index
    %c0_2 = arith.constant 0 : index
    %1 = vector.load %arg1[%c0_1, %c0_2] : memref<36x128xf32, #tpu.memory_space<vmem>>, vector<36x128xf32>
    %cst = arith.constant dense<0.000000e+00> : vector<8x128xf32>
    %2 = tpu.matmul %0, %1, %cst {dimension_numbers = #tpu.dot_dimension_numbers<[1], [0], [0], [1], [0, 0, 1, 1], [], []>} : vector<8x36xf32>, vector<36x128xf32>, vector<8x128xf32> -> vector<8x128xf32>
    %c0_3 = arith.constant 0 : index
    %c0_4 = arith.constant 0 : index
    %3 = vector.load %arg3[%c0_3, %c0_4] : memref<1x128xf32, #tpu.memory_space<vmem>>, vector<1x128xf32>
    %cst_5 = arith.constant 0.000000e+00 : f32
    %4 = vector.broadcast %cst_5 : f32 to vector<1x128xf32>
    %5 = arith.cmpf oeq, %3, %4 : vector<1x128xf32>
    %cst_6 = arith.constant 1.000000e+00 : f32
    %6 = vector.broadcast %cst_6 : f32 to vector<1x128xf32>
    %7 = arith.select %5, %6, %3 : vector<1x128xi1>, vector<1x128xf32>
    %8 = vector.broadcast %7 : vector<1x128xf32> to vector<8x128xf32>
    %9 = arith.divf %2, %8 : vector<8x128xf32>
    %cst_7 = arith.constant 0.000000e+00 : f32
    %10 = vector.shape_cast %5 : vector<1x128xi1> to vector<1x128xi1>
    %11 = vector.broadcast %10 : vector<1x128xi1> to vector<8x128xi1>
    %12 = vector.broadcast %cst_7 : f32 to vector<8x128xf32>
    %13 = arith.select %11, %12, %9 : vector<8x128xi1>, vector<8x128xf32>
    %c0_8 = arith.constant 0 : index
    %c0_9 = arith.constant 0 : index
    %14 = vector.load %arg4[%c0_8, %c0_9] : memref<8x128xf32, #tpu.memory_space<vmem>>, vector<8x128xf32>
    tpu.vector_store %arg4[%c0_8, %c0_9], %13 {strides = array<i32>} : memref<8x128xf32, #tpu.memory_space<vmem>>, vector<8x128xf32>,
    %cst_10 = arith.constant dense<0.000000e+00> : vector<8xf32>
    %15 = vector.multi_reduction <add>, %13, %cst_10 [1] : vector<8x128xf32> to vector<8xf32>
    %16 = vector.shape_cast %15 : vector<8xf32> to vector<8x1xf32>
    %17 = arith.mulf %13, %13 : vector<8x128xf32>
    %cst_11 = arith.constant dense<0.000000e+00> : vector<8xf32>
    %18 = vector.multi_reduction <add>, %17, %cst_11 [1] : vector<8x128xf32> to vector<8xf32>
    %19 = vector.shape_cast %18 : vector<8xf32> to vector<8x1xf32>
    %c0_i32 = arith.constant 0 : i32
    %20 = arith.cmpi eq, %arg0, %c0_i32 : i32
    %21 = arith.extui %20 : i1 to i32
    %c0_i32_12 = arith.constant 0 : i32
    %22 = arith.cmpi ne, %21, %c0_i32_12 : i32
    scf.if %22 {
      %cst_21 = arith.constant 0.000000e+00 : f32
      %29 = vector.broadcast %cst_21 : f32 to vector<8x1xf32>
      %c0_22 = arith.constant 0 : index
      %c0_23 = arith.constant 0 : index
      %30 = vector.load %arg5[%c0_22, %c0_23] : memref<8x1xf32, #tpu.memory_space<vmem>>, vector<8x1xf32>
      tpu.vector_store %arg5[%c0_22, %c0_23], %29 {strides = array<i32>} : memref<8x1xf32, #tpu.memory_space<vmem>>, vector<8x1xf32>,
      %cst_24 = arith.constant 0.000000e+00 : f32
      %31 = vector.broadcast %cst_24 : f32 to vector<8x1xf32>
      %c0_25 = arith.constant 0 : index
      %c0_26 = arith.constant 0 : index
      %32 = vector.load %arg6[%c0_25, %c0_26] : memref<8x1xf32, #tpu.memory_space<vmem>>, vector<8x1xf32>
      tpu.vector_store %arg6[%c0_25, %c0_26], %31 {strides = array<i32>} : memref<8x1xf32, #tpu.memory_space<vmem>>, vector<8x1xf32>,
    } else {
    }
    %c0_13 = arith.constant 0 : index
    %c0_14 = arith.constant 0 : index
    %23 = vector.load %arg5[%c0_13, %c0_14] : memref<8x1xf32, #tpu.memory_space<vmem>>, vector<8x1xf32>
    %24 = arith.addf %23, %16 : vector<8x1xf32>
    %c0_15 = arith.constant 0 : index
    %c0_16 = arith.constant 0 : index
    %25 = vector.load %arg5[%c0_15, %c0_16] : memref<8x1xf32, #tpu.memory_space<vmem>>, vector<8x1xf32>
    tpu.vector_store %arg5[%c0_15, %c0_16], %24 {strides = array<i32>} : memref<8x1xf32, #tpu.memory_space<vmem>>, vector<8x1xf32>,
    %c0_17 = arith.constant 0 : index
    %c0_18 = arith.constant 0 : index
    %26 = vector.load %arg6[%c0_17, %c0_18] : memref<8x1xf32, #tpu.memory_space<vmem>>, vector<8x1xf32>
    %27 = arith.addf %26, %19 : vector<8x1xf32>
    %c0_19 = arith.constant 0 : index
    %c0_20 = arith.constant 0 : index
    %28 = vector.load %arg6[%c0_19, %c0_20] : memref<8x1xf32, #tpu.memory_space<vmem>>, vector<8x1xf32>
    tpu.vector_store %arg6[%c0_19, %c0_20], %27 {strides = array<i32>} : memref<8x1xf32, #tpu.memory_space<vmem>>, vector<8x1xf32>,
    return
  }
  func.func @transform_0(%arg0: i32) -> (i32, i32) {
    %c0_i32 = arith.constant 0 : i32
    %c0_i32_0 = arith.constant 0 : i32
    return %c0_i32, %arg0 : i32, i32
  }
  func.func @transform_1(%arg0: i32) -> (i32, i32) {
    %c0_i32 = arith.constant 0 : i32
    %c0_i32_0 = arith.constant 0 : i32
    %c0_i32_1 = arith.constant 0 : i32
    return %c0_i32, %c0_i32_0 : i32, i32
  }
  func.func @transform_2(%arg0: i32) -> (i32, i32) {
    %c0_i32 = arith.constant 0 : i32
    %c0_i32_0 = arith.constant 0 : i32
    return %c0_i32, %arg0 : i32, i32
  }
  func.func @transform_3(%arg0: i32) -> (i32, i32) {
    %c0_i32 = arith.constant 0 : i32
    %c0_i32_0 = arith.constant 0 : i32
    return %c0_i32, %arg0 : i32, i32
  }
  func.func @transform_4(%arg0: i32) -> (i32, i32) {
    %c0_i32 = arith.constant 0 : i32
    %c0_i32_0 = arith.constant 0 : i32
    %c0_i32_1 = arith.constant 0 : i32
    return %c0_i32, %c0_i32_0 : i32, i32
  }
  func.func @transform_5(%arg0: i32) -> (i32, i32) {
    %c0_i32 = arith.constant 0 : i32
    %c0_i32_0 = arith.constant 0 : i32
    %c0_i32_1 = arith.constant 0 : i32
    return %c0_i32, %c0_i32_0 : i32, i32
  }
}

</mosaic_0001>

<bundles_post_ra>
// kernel: tpu_custom_call.1
= control target key start
LH: loop header
LB: loop body
LE: loop exit
PB: predicated region body
PF: predicated region fallthrough
CT: control target
= control target key end

     0   :  { %11 = vsyncpa [#allocation3], 0  ;;  %s1002_s0 = inlined_call_operand.hbm [shape: f32[36,512], index: 0, kind: input, shape index: {}]   ;;  %s1003_s1 = inlined_call_operand.hbm [shape: f32[8,36], index: 1, kind: input, shape index: {}]   ;;  %s1004_s2 = inlined_call_operand.vmem [shape: f32[1,512], index: 2, kind: input, shape index: {}]   ;;  %s1005_s3 = inlined_call_operand.hbm [shape: f32[8,512], index: 3, kind: output, shape index: {0}]   ;;  %s1006_s4 = inlined_call_operand.vmem [shape: f32[8,1], index: 4, kind: output, shape index: {1}]   ;;  %s1007_s5 = inlined_call_operand.vmem [shape: f32[8,1], index: 5, kind: output, shape index: {2}]  }
   0x1   :  { %13 = vsyncpa [#allocation3 + $0x1], 0 }
   0x2   :  { %14 = vsyncpa [#allocation6], 0 }
   0x3   :  { %15 = vsyncpa [#allocation4], 0 }
   0x4   :  { %17 = vsyncpa [#allocation4 + $0x1], 0  ;;  %s781_s18 = smov 0   ;;  %s783_s19 = smov 0  }
   0x5   :  { %s785_s20 = smov 0   ;;  %s787_s21 = smov 0  }
   0x6 LB: > { %s802_s22 = sadd.s32 4294967295, %s738_s21   ;;  %s501_s23 = sadd.s32 4294967294, %s738_s21   ;;  %s738_s21 = sphi %s787_s21, %s1032_s21   ;;  %s734_s20 = sphi %s785_s20, %s1031_s20   ;;  %s730_s19 = sphi %s783_s19, %s1030_s19   ;;  %s726_s18 = sphi %s781_s18, %s1029_s18  }
   0x7   : > { %s806_s24 = sadd.s32 1, %s738_s21   ;;  %s30_s25 = sadd.s32 1, %s734_s20 }
   0x8   : > { %s27_s26 = ssub.s32 %s738_s21, %s806_s24  ;;  %p37_p0 = scmp.ne.s32.totalorder %s734_s20, %s730_s19 }
   0x9   : > { %p28_p1 = scmp.eq.s32.totalorder %s27_s26, 0  ;;  %p38_p2 = scmp.eq.s32.totalorder %s738_s21, 0 }
   0xa   : > { %p43_p3 = scmp.ne.s32.totalorder %s730_s19, %s726_s18  ;;  %p1008_p4 = scmp.eq.s32.totalorder %s802_s22, 0 }
   0xb   : > { %s818_s27 = scalar_select %p28_p1, %s734_s20, %s30_s25  }
   0xc   : > { %p820_p5 = por %p38_p2, %p37_p0  ;;  %p826_p6 = por %p1008_p4, %p43_p3 }
   0xd   : > { %p114_p7 = scmp.eq.s32.totalorder %s802_s22, 3  ;;  %p120_p8 = scmp.eq.s32.totalorder %s501_s23, 3 }
   0xe   : > { %s1014_s29 = scalar_select %p826_p6, 1, 0 }
   0xf   : > { %p502_p9 = scmp.ge.s32.totalorder %s738_s21, 1  ;;  %p169_p10 = scmp.lt.s32.totalorder %s738_s21, 5 }
  0x10   : > { %p833_p11 = por %p114_p7, %p37_p0  ;;  %p837_p12 = por %p120_p8, %p43_p3 }
  0x11   : > { %p841_p13 = pnand %p502_p9, %p169_p10  ;;  %s740_s8 = smov [#allocation5]  }
  0x12   : > { %s1015_s30 = scalar_select %p833_p11, 1, 0 }
  0x13   : > { %s1016_s6 = scalar_select %p837_p12, 1, 0 }
  0x14   : > { %s1017_s7 = scalar_select %p841_p13, 1, 0 }
  0x15   : > { %p551_p2 = pneg %p841_p13  ;;  %s182_s9 = sshll.u32 %s740_s8, 4  ;;  %s183_s9 = int_to_ptr.vmem [resolvable:$true] %s182_s9 }
  0x16   : > { %p564_p4 = scmp.lt.s32.totalorder %s738_s21, 4  ;;  %p1018_p0 = scmp.eq.s32.totalorder %s802_s22, 0 }
  0x17   : > { %s193_s11 = sand.u32 1, %s734_s20   ;;  %s610_s16 = scalar_lea.hbm %s1003_s1, 128 }
  0x18   : > { %p851_p7 = pnand %p551_p2, %p1018_p0  ;;  %p858_p3 = pnand %p564_p4, %p820_p5 }
  0x19   : > { %s541_s13 = smul.u32 40, %s193_s11  ;;  %p611_p8 = scmp.ne.s32.totalorder %s1003_s1, %s610_s16 }
  0x1a   : > { %s1020_s12 = scalar_select %p858_p3, 1, 0 }
  0x1b   : > { %p612_p9 = pneg %p851_p7  ;;  %p617_p4 = scmp.lt.u32.totalorder %s610_s16, %s1003_s1 }
  0x1d   : > { %p613_p10 = pnand %p612_p9, %p611_p8 }
  0x1f   : > { %p614_p2 = pneg %p613_p10 }
  0x21   : > { %p619_p5 = pnand %p617_p4, %p614_p2 }
  0x23   : > { %622 = shalt.err (!%p619_p5)
}
  0x24   : > { %s623_s28 = scalar_lea.vmem %s183_s9, 128  ;;  %p631_p11 = scmp.lt.s32.totalorder %s183_s9, %s183_s9 }
  0x25   : > { %p624_p0 = scmp.ne.s32.totalorder %s183_s9, %s623_s28  ;;  %p632_p6 = scmp.lt.s32.totalorder %s623_s28, %s623_s28 }
  0x27   : > { %p626_p1 = pnand %p624_p0, %p612_p9  ;;  %p633_p13 = por %p632_p6, %p631_p11 }
  0x29   : > { %p627_p12 = pneg %p626_p1 }
  0x2b   : > { %p634_p3 = pnand %p633_p13, %p627_p12 }
  0x2d   : > { %637 = shalt.err (!%p634_p3)
}
  0x2e   : > { %554 = dma.hbm_to_vmem [thread:$0]  (!%p851_p7), %s1003_s1, 128, %s183_s9, [#allocation6]  }
  0x2f   : > { %s505_s15 = sshll.u32 %s738_s21, 7  ;;  %s197_s16 = scalar_lea.vmem [#allocation2], %s541_s13 }
  0x30   : > { %s203_s17 = sshll.u32 %s197_s16, 4  ;;  %s882_s26 = scalar_lea.hbm %s1002_s0, %s505_s15  ;;  %s884_s17 = int_to_ptr.vmem [resolvable:$true] %s203_s17 }
  0x31   : > { %s886_s10 = scalar_lea.sflag [#allocation3], %s193_s11  ;;  %s638_s28 = scalar_lea.hbm %s882_s26, 640 }
  0x32   : > { %p639_p6 = scmp.ne.s32.totalorder %s882_s26, %s638_s28  ;;  %p1021_p11 = scmp.ne.s32.totalorder %s1020_s12, 0 }
  0x33   : > { %s643_s8 = scalar_lea.hbm %s1002_s0, 2560  ;;  %p644_p7 = scmp.lt.u32.totalorder %s882_s26, %s1002_s0 }
  0x34   : > { %p640_p12 = pneg %p1021_p11  ;;  %p645_p3 = scmp.lt.u32.totalorder %s643_s8, %s638_s28 }
  0x35   : > { %p647_p9 = scmp.lt.u32.totalorder %s638_s28, %s882_s26 }
  0x36   : > { %p641_p13 = pnand %p640_p12, %p639_p6  ;;  %p646_p8 = por %p645_p3, %p644_p7 }
  0x38   : > { %p642_p1 = pneg %p641_p13  ;;  %p648_p10 = por %p647_p9, %p646_p8 }
  0x3a   : > { %p649_p2 = pnand %p648_p10, %p642_p1 }
  0x3c   : > { %652 = shalt.err (!%p649_p2)
}
  0x3d   : > { %s653_s11 = scalar_lea.vmem %s884_s17, 640  ;;  %s741_s16 = smov [#allocation2]  }
  0x3e   : > { %p654_p4 = scmp.ne.s32.totalorder %s884_s17, %s653_s11  ;;  %s658_s23 = sshll.u32 %s741_s16, 4  ;;  %s659_s23 = int_to_ptr.vmem [resolvable:$false] %s658_s23 }
  0x3f   : > { %s660_s25 = scalar_lea.vmem %s659_s23, 1280  ;;  %p661_p6 = scmp.lt.s32.totalorder %s884_s17, %s659_s23 }
  0x40   : > { %p656_p5 = pnand %p654_p4, %p640_p12  ;;  %p662_p13 = scmp.lt.s32.totalorder %s660_s25, %s653_s11 }
  0x42   : > { %p657_p0 = pneg %p656_p5  ;;  %p663_p7 = por %p662_p13, %p661_p6 }
  0x44   : > { %p664_p3 = pnand %p663_p7, %p657_p0 }
  0x46   : > { %667 = shalt.err (!%p664_p3)
}
  0x47   : > { %s742_s28 = smov 512   ;;  %s743_s9 = smov 128  }
  0x48   : > { %s744_s13 = smov 8   ;;  %p1022_p12 = scmp.ne.s32.totalorder %s1017_s7, 0 }
  0x49   : > { %558 = dma.hbm_to_vmem [thread:$0]  (!%p1021_p11), %s882_s26, 640, %s884_s17, %s886_s10, %s742_s28, %s743_s9, %s744_s13  }
  0x4a   : > { %221 = sbr.rel (%p1022_p12) target bundleno = 483 (0x1e3), region = 32  ;;  %s917_s8 = sand.u32 (!%p1022_p12), 1, %s730_s19  }
  0x4b   : > { %s542_s14 = smul.u32 (!%p1022_p12), 40, %s917_s8  ;;  %s224_s15 = scalar_lea.sflag (!%p1022_p12), [#allocation3], %s917_s8 }
  0x4c   : > { %p1023_p1 = scmp.ne.s32.totalorder (!%p1022_p12), %s1014_s29, 0 }
  0x4d   : > { %s227_s11 = scalar_lea.vmem (!%p1022_p12), [#allocation2], %s542_s14 }
  0x51   : > { %713 = dma.done.wait (%p1023_p1), %s224_s15, 640  }
  0x52   : > { %715 = vsyncadd (%p1023_p1), %s224_s15, 4294966656  ;;  %p1024_p8 = scmp.eq.s32.totalorder %s802_s22, 0 }
  0x54   : > { %717 = dma.done.wait (%p1024_p8), [#allocation6], 128   ;;  %p1025_p11 = pmov %p1024_p8 }
  0x55   : > { %v745_v0 = vmov 0.0|0.0   ;;  %vm746_vm0 = vmmov 0   ;;  %v747_v1 = vmov 0.0   ;;  %v265_v2 = vld [vmem:[%s227_s11] sm:$0xff]  ;;  %v266_v3 = vld [vmem:[%s227_s11 + $0x8] sm:$0xff]  ;;  %v267_v4 = vld [vmem:[%s227_s11 + $0x10] sm:$0xff]  ;;  %v352_v10 = vlaneseq }
  0x56   : > { %719 = vsyncadd (%p1025_p11), [#allocation6], 4294967168  ;;  %535 = vmatprep.subr.bf16.mxu0 %v745_v0  ;;  %532 = vmatprep.mubr.msk.f32.mxu0 %vm746_vm0, %v747_v1  ;;  %v536_v5 = vpack.c.bf16 %v266_v3, %v265_v2  ;;  %v268_v6 = vld [vmem:[%s227_s11 + $0x18] sm:$0xff]  ;;  %v269_v8 = vld [vmem:[%s227_s11 + $0x20] sm:$0xf]  ;;  %vm274_vm1 = vcmask 1043456  }
  0x57   : > { %v539_v7 = vpack.c.bf16 %v268_v6, %v267_v4  ;;  %v264_v9 = vld [vmem:[#allocation5] sm:$0xff]  ;;  %vm270_vm2 = vcmask 293888   ;;  %p261_p9 = scmp.lt.s32.totalorder %s802_s22, 3  ;;  %v353_v12 = vshrl.u32 %v352_v10, 7  ;;  %v748_v16 = vmov 0   ;;  %s508_s26 = sshll.u32 %s917_s8, 3 }
  0x58   : > { %537 = vmatpush3.bf16.msra.mxu0 %v536_v5  ;;  %s256_s10 = scalar_lea.vmem [#allocation7], %s508_s26  ;;  %p1026_p10 = scmp.ne.s32.totalorder %s802_s22, 0 }
  0x59   : > { %538 = vmatprep.subr.bf16.mxu0 %v745_v0  ;;  %s262_s29 = scalar_select %p261_p9, %s802_s22, 3  ;;  %v354_v13 = vsub.s32 0, %v353_v12 }
  0x5a   : > { %vm376_vm5 = vcmask (!%p1026_p10), 7168   ;;  %v749_v27 = vmov (!%p1026_p10), 0.0  }
  0x5b   : > { %s263_s17 = scalar_lea.vmem %s1004_s2, %s262_s29  ;;  %377 = vst.msk [vmem:[%s1006_s4] sm:$0xff] (!%p1026_p10), %vm376_vm5, %v749_v27  ;;  %378 = vst.msk [vmem:[%s1007_s5] sm:$0xff] (!%p1026_p10), %vm376_vm5, %v749_v27 }
  0x5c   : > { %540 = vmatpush3.bf16.msra.mxu0 %v539_v7  ;;  %v348_v11 = vld [vmem:[%s263_s17] sm:$0x1] }
  0x5d   : > { %530 = vmatprep.subr.mxu0 %v747_v1  ;;  %vm349_vm3 = vcmp.eq.f32.partialorder %v348_v11, 0.0 }
  0x5e   : > { %v350_v14 = vsel %vm349_vm3, 1.0, %v348_v11  ;;  %v359_v17 = vsel %vm349_vm3, 1, %v748_v16 }
  0x5f   : > { %v355_v15 = vrot.slane %v350_v14, %v354_v13  ;;  %v363_v18 = vrot.slane %v359_v17, %v354_v13 }
  0x60   : > { %531 = vmatpush3.msk.msra.mxu0 %vm274_vm1, %v269_v8 }
  0x61   : > { %533 = vmatmul.mubr.msk.f32.vlgmr.msra.gmra.mrb[0].mxu0 %vm270_vm2, %v264_v9  ;;  %608 = vrcp.f32 %v355_v15  ;;  %vm364_vm4 = vcmp.eq.s32.totalorder %v363_v18, 1 }
  0x6b   : > { %v609_v19 = vpop.eup %608 }
 0x134   : > { %v344_v20 = vpop.f32.mrb[0].mxu0 }
 0x135   : > { %v358_v21 = vmul.f32 %v609_v19, %v344_v20  ;;  %v534_v22 = vpop.f32.mrb[1].mxu0 }
 0x137   : > { %v365_v23 = vsel %vm364_vm4, 0.0, %v358_v21 }
 0x138   : > { %367 = vadd.xlane.f32.xlu0 %v365_v23  ;;  %366 = vst [vmem:[%s256_s10] sm:$0xff] %v365_v23  ;;  %v369_v24 = vmul.f32 %v365_v23, %v365_v23 }
 0x13c   : > { %370 = vadd.xlane.f32.xlu0 %v369_v24 }
 0x1c3   : > { %375 = sbr.rel (%p1026_p10) target bundleno = 458 (0x1ca), region = 44 }
 0x1c5   : > { %v368_v25 = vpop.xlane.xlu0 %367 }
 0x1c9   : > { %v371_v26 = vpop.xlane.xlu0 %370 }
 0x1ca PF: > { %v379_v28 = vld [vmem:[%s1006_s4] sm:$0xff]  ;;  %vm381_vm6 = vcmask 7168   ;;  %s513_s11 = sshll.u32 %s802_s22, 7  ;;  %s400_s17 = sshll.u32 %s256_s10, 4  ;;  %s955_s17 = int_to_ptr.vmem [resolvable:$true] %s400_s17 }
 0x1cb   : > { %v383_v29 = vld [vmem:[%s1007_s5] sm:$0xff]  ;;  %v380_v30 = vadd.f32 %v379_v28, %v368_v25  ;;  %s953_s12 = scalar_lea.hbm %s1005_s3, %s513_s11  ;;  %s387_s22 = scalar_lea.sflag [#allocation4], %s917_s8 }
 0x1cc   : > { %v384_v31 = vadd.f32 %v383_v29, %v371_v26  ;;  %s668_s28 = scalar_lea.vmem %s955_s17, 128  ;;  %p1027_p4 = scmp.ne.s32.totalorder %s1015_s30, 0 }
 0x1cd   : > { %382 = vst.msk [vmem:[%s1006_s4] sm:$0xff] %vm381_vm6, %v380_v30  ;;  %p669_p2 = scmp.ne.s32.totalorder %s955_s17, %s668_s28  ;;  %s750_s10 = smov [#allocation7]  }
 0x1ce   : > { %385 = vst.msk [vmem:[%s1007_s5] sm:$0xff] %vm381_vm6, %v384_v31  ;;  %s672_s9 = sshll.u32 %s750_s10, 4  ;;  %s673_s9 = int_to_ptr.vmem [resolvable:$false] %s672_s9 }
 0x1cf   : > { %p670_p5 = pnand %p669_p2, %p1027_p4  ;;  %s674_s13 = scalar_lea.vmem %s673_s9, 256 }
 0x1d0   : > { %p675_p6 = scmp.lt.s32.totalorder %s955_s17, %s673_s9  ;;  %p676_p13 = scmp.lt.s32.totalorder %s674_s13, %s668_s28 }
 0x1d1   : > { %p671_p0 = pneg %p670_p5 }
 0x1d2   : > { %p677_p7 = por %p676_p13, %p675_p6 }
 0x1d4   : > { %p678_p3 = pnand %p677_p7, %p671_p0 }
 0x1d6   : > { %681 = shalt.err (!%p678_p3)
}
 0x1d7   : > { %s682_s8 = scalar_lea.hbm %s953_s12, 128  ;;  %s686_s11 = scalar_lea.hbm %s1005_s3, 512 }
 0x1d8   : > { %p683_p12 = scmp.ne.s32.totalorder %s953_s12, %s682_s8  ;;  %p687_p11 = scmp.lt.u32.totalorder %s953_s12, %s1005_s3 }
 0x1d9   : > { %p688_p9 = scmp.lt.u32.totalorder %s686_s11, %s682_s8  ;;  %p690_p2 = scmp.lt.u32.totalorder %s682_s8, %s953_s12 }
 0x1da   : > { %p684_p1 = pnand %p683_p12, %p1027_p4 }
 0x1db   : > { %p689_p10 = por %p688_p9, %p687_p11 }
 0x1dc   : > { %p685_p8 = pneg %p684_p1 }
 0x1dd   : > { %p691_p5 = por %p690_p2, %p689_p10 }
 0x1df   : > { %p692_p0 = pnand %p691_p5, %p685_p8 }
 0x1e1   : > { %695 = shalt.err (!%p692_p0)
}
 0x1e2   : > { %549 = dma.vmem_to_hbm [thread:$0]  (%p1027_p4), %s955_s17, 128, %s953_s12, %s387_s22  }
 0x1e3 PF: > { %p566_p6 = scmp.ge.s32.totalorder %s738_s21, 2  ;;  %s424_s26 = sand.u32 1, %s726_s18  }
 0x1e4   : > { %p1028_p13 = scmp.ne.s32.totalorder %s1016_s6, 0  ;;  %s425_s16 = scalar_lea.sflag [#allocation4], %s424_s26 }
 0x1e6   : > { %p560_p7 = pnand %p566_p6, %p1028_p13 }
 0x1e8   : > { %721 = dma.done.wait (!%p560_p7), %s425_s16, 128  }
 0x1e9   : > { %723 = vsyncadd (!%p560_p7), %s425_s16, 4294967168  ;;  %p20_p3 = scmp.ge.s32.totalorder %s806_s24, 6   ;;  %s1029_s18 = smov %s730_s19 }
 0x1ea   : > { %s1030_s19 = smov %s734_s20  ;;  %s1031_s20 = smov %s818_s27 }
 0x1eb   : > { %s1032_s21 = smov %s806_s24  ;;  %22 = sbr.rel (!%p20_p3) target bundleno = 6 (0x6), region = 104 }
 0x1f2   :  { %430 = vsyncpa [#allocation3], 1 }
 0x1f3   :  { %432 = vsyncpa [#allocation3 + $0x1], 1 }
 0x1f4   :  { %433 = vsyncpa [#allocation6], 1 }
 0x1f5   :  { %434 = vsyncpa [#allocation4], 1 }
 0x1f6   :  { %436 = vsyncpa [#allocation4 + $0x1], 1 }

</bundles_post_ra>
